<compile_context>
chip_gen: v7x
topology: tpu7x:2x2x1
jax: 0.10.0
libtpu: 0.0.40
codegen_flags: <defaults>
</compile_context>

<pallas_src>
import numpy as np

import jax
import jax.numpy as jnp
from jax.experimental import pallas as pl
from jax.experimental.pallas import tpu as pltpu


def _pos_enc_kernel(x_ref, pe_ref, o_ref):
    """x_ref: (B, S*E), pe_ref: (1, S*E) broadcast over batch, o_ref: (B, S*E)."""
    o_ref[...] = x_ref[...] + pe_ref[...]


def positional_encoding_forward(x, pe):
    """x: (B, S, E). pe: (max_seq_len, E) sin/cos table (the nn.Parameter).
    Returns x + pe[:S, :], shape (B, S, E) — same as the PyTorch forward."""
    B, S, E = x.shape
    assert pe.shape[0] >= S and pe.shape[1] == E

    SE = S * E
    # Lane-dense presentation: flatten (S, E) -> S*E on the lane axis.
    x2 = x.reshape(B, SE)
    pe2 = pe[:S, :].reshape(1, SE)

    out2 = pl.pallas_call(
        _pos_enc_kernel,
        out_shape=jax.ShapeDtypeStruct((B, SE), x.dtype),
        grid_spec=pltpu.PrefetchScalarGridSpec(
            num_scalar_prefetch=0,
            grid=(1,),
            in_specs=[
                pl.BlockSpec((B, SE), lambda i: (0, 0)),   # x slab
                pl.BlockSpec((1, SE), lambda i: (0, 0)),   # pe row (broadcast over B)
            ],
            out_specs=pl.BlockSpec((B, SE), lambda i: (0, 0)),
        ),
        compiler_params=pltpu.CompilerParams(
            dimension_semantics=("arbitrary",)),
    )(x2, pe2)

    return out2.reshape(B, S, E)


def make_positional_encoding(max_seq_len, embed_dim, dtype=jnp.float32):
    """Same init as the PyTorch module's nn.Parameter (sin/cos interleave)."""
    position = np.arange(max_seq_len, dtype=np.float64)[:, None]
    div_term = np.exp(
        np.arange(0, embed_dim, 2, dtype=np.float64) * -(np.log(10000.0) / embed_dim))
    pe = np.zeros((max_seq_len, embed_dim), dtype=np.float64)
    pe[:, 0::2] = np.sin(position * div_term)
    pe[:, 1::2] = np.cos(position * div_term)
    return jnp.asarray(pe, dtype=dtype)


def _reference(x, pe):
    """Pure-JAX reference mirroring the PyTorch forward."""
    S = x.shape[1]
    return x + pe[:S, :]


if __name__ == "__main__":
    batch, seq, embed_dim, max_seq_len = 2, 8, 32, 700

    key = jax.random.PRNGKey(0)
    x = jax.random.normal(key, (batch, seq, embed_dim), jnp.float32)
    pe = make_positional_encoding(max_seq_len, embed_dim)

    out = positional_encoding_forward(x, pe)
    out = jax.block_until_ready(out)

    ref = _reference(x, pe)
    np.testing.assert_allclose(np.asarray(out), np.asarray(ref),
                               rtol=1e-6, atol=1e-6)
    assert out.shape == (batch, seq, embed_dim)
    print("KERNEL_OK")
</pallas_src>

<mosaic_0001>
module attributes {stable_mosaic.version = 11 : i64} {
  func.func @_pos_enc_kernel(%arg0: i32, %arg1: memref<2x256xf32, #tpu.memory_space<vmem>>, %arg2: memref<1x256xf32, #tpu.memory_space<vmem>>, %arg3: memref<2x256xf32, #tpu.memory_space<vmem>>) attributes {dimension_semantics = [#tpu.dimension_semantics<arbitrary>], iteration_bounds = array<i64: 1>, scalar_prefetch = 0 : i64, scratch_operands = 0 : i64, tpu.core_type = #tpu.core_type<tc>, window_params = [{pipeline_mode = #tpu.pipeline_mode<synchronous>, transform_indices = @transform_0, window_bounds = array<i64: 2, 256>}, {pipeline_mode = #tpu.pipeline_mode<synchronous>, transform_indices = @transform_1, window_bounds = array<i64: 1, 256>}, {pipeline_mode = #tpu.pipeline_mode<synchronous>, transform_indices = @transform_2, window_bounds = array<i64: 2, 256>}]} {
    %c0 = arith.constant 0 : index
    %c0_0 = arith.constant 0 : index
    %0 = vector.load %arg1[%c0, %c0_0] : memref<2x256xf32, #tpu.memory_space<vmem>>, vector<2x256xf32>
    %c0_1 = arith.constant 0 : index
    %c0_2 = arith.constant 0 : index
    %1 = vector.load %arg2[%c0_1, %c0_2] : memref<1x256xf32, #tpu.memory_space<vmem>>, vector<1x256xf32>
    %2 = vector.broadcast %1 : vector<1x256xf32> to vector<2x256xf32>
    %3 = arith.addf %0, %2 : vector<2x256xf32>
    %c0_3 = arith.constant 0 : index
    %c0_4 = arith.constant 0 : index
    %4 = vector.load %arg3[%c0_3, %c0_4] : memref<2x256xf32, #tpu.memory_space<vmem>>, vector<2x256xf32>
    tpu.vector_store %arg3[%c0_3, %c0_4], %3 {strides = array<i32>} : memref<2x256xf32, #tpu.memory_space<vmem>>, vector<2x256xf32>,
    return
  }
  func.func @transform_0(%arg0: i32) -> (i32, i32) {
    %c0_i32 = arith.constant 0 : i32
    %c0_i32_0 = arith.constant 0 : i32
    %c0_i32_1 = arith.constant 0 : i32
    return %c0_i32, %c0_i32_0 : i32, i32
  }
  func.func @transform_1(%arg0: i32) -> (i32, i32) {
    %c0_i32 = arith.constant 0 : i32
    %c0_i32_0 = arith.constant 0 : i32
    %c0_i32_1 = arith.constant 0 : i32
    return %c0_i32, %c0_i32_0 : i32, i32
  }
  func.func @transform_2(%arg0: i32) -> (i32, i32) {
    %c0_i32 = arith.constant 0 : i32
    %c0_i32_0 = arith.constant 0 : i32
    %c0_i32_1 = arith.constant 0 : i32
    return %c0_i32, %c0_i32_0 : i32, i32
  }
}

</mosaic_0001>

<bundles_post_ra>
// kernel: tpu_custom_call.1
= control target key start
LH: loop header
LB: loop body
LE: loop exit
PB: predicated region body
PF: predicated region fallthrough
CT: control target
= control target key end

     0   :  { %7 = vsyncpa [#allocation3], 0  ;;  %s157_s0 = inlined_call_operand.hbm [shape: f32[2,256], index: 0, kind: input, shape index: {}]   ;;  %s158_s1 = inlined_call_operand.vmem [shape: f32[1,256], index: 1, kind: input, shape index: {}]   ;;  %s159_s2 = inlined_call_operand.hbm [shape: f32[2,256], index: 2, kind: output, shape index: {}]  }
   0x1   :  { %8 = vsyncpa [#allocation4], 0  ;;  %s112_s9 = smov [#allocation2]   ;;  %s64_s13 = scalar_lea.hbm %s157_s0, 64 }
   0x2   :  { %s15_s10 = sshll.u32 %s112_s9, 4  ;;  %p65_p0 = scmp.ne.s32.totalorder %s157_s0, %s64_s13  ;;  %s16_s10 = int_to_ptr.vmem [resolvable:$true] %s15_s10 }
   0x3   :  { %p68_p1 = scmp.lt.u32.totalorder %s64_s13, %s157_s0 }
   0x5   :  { %p70_p2 = pnand %p68_p1, %p65_p0 }
   0x7   :  { %73 = shalt.err (!%p70_p2)
}
   0x8   :  { %s74_s18 = scalar_lea.vmem %s16_s10, 64  ;;  %p79_p4 = scmp.lt.s32.totalorder %s16_s10, %s16_s10 }
   0x9   :  { %p75_p3 = scmp.ne.s32.totalorder %s16_s10, %s74_s18  ;;  %p80_p5 = scmp.lt.s32.totalorder %s74_s18, %s74_s18 }
   0xb   :  { %p81_p6 = por %p80_p5, %p79_p4 }
   0xd   :  { %p82_p7 = pnand %p81_p6, %p75_p3 }
   0xf   :  { %85 = shalt.err (!%p82_p7)
}
  0x10   :  { %18 = dma.hbm_to_vmem [thread:$0]  %s157_s0, 64, %s16_s10, [#allocation3]  }
  0x11   :  { %108 = dma.done.wait [#allocation3], 64  }
  0x12   :  { %109 = vsyncadd [#allocation3], 4294967232  ;;  %v27_v0 = vlaneseq  ;;  %v113_v1 = vmov 1983009808   ;;  %v25_v7 = vld [vmem:[%s158_s1] sm:$0x3] }
  0x13   :  { %v37_v2 = vunpack.c.l.s4 %v113_v1  ;;  %v24_v12 = vld [vmem:[#allocation2] sm:$0xf]  ;;  %s114_s23 = smov [#allocation5]  }
  0x14   :  { %v28_v3 = vshrl.u32 %v27_v0, 7  ;;  %s52_s0 = sshll.u32 %s114_s23, 4  ;;  %s53_s0 = int_to_ptr.vmem [resolvable:$true] %s52_s0 }
  0x15   :  { %v38_v6 = vunpack.c.0.s8 %v37_v2  ;;  %s86_s24 = scalar_lea.vmem %s53_s0, 64  ;;  %p91_p9 = scmp.lt.s32.totalorder %s53_s0, %s53_s0 }
  0x16   :  { %v29_v4 = vsub.s32 0, %v28_v3  ;;  %v33_v5 = vsub.s32 1, %v28_v3  ;;  %p87_p8 = scmp.ne.s32.totalorder %s53_s0, %s86_s24  ;;  %p92_p10 = scmp.lt.s32.totalorder %s86_s24, %s86_s24 }
  0x17   :  { %v41_v10 = vsub.s32 %v38_v6, %v28_v3 }
  0x18   :  { %v30_v8 = vrot.slane %v25_v7, %v29_v4  ;;  %v34_v9 = vrot.slane %v25_v7, %v33_v5  ;;  %p93_p11 = por %p92_p10, %p91_p9 }
  0x1a   :  { %v35_v11 = vcombine.low %v30_v8, %v34_v9  ;;  %p94_p12 = pnand %p93_p11, %p87_p8 }
  0x1c   :  { %v42_v13 = vrot.slane %v35_v11, %v41_v10 }
  0x1e   :  { %v44_v14 = vadd.f32 %v42_v13, %v24_v12 }
  0x20   :  { %45 = vst [vmem:[#allocation5] sm:$0xf] %v44_v14 }
  0x21   :  { %97 = shalt.err (!%p94_p12)
}
  0x22   :  { %s98_s26 = scalar_lea.hbm %s159_s2, 64 }
  0x23   :  { %p99_p13 = scmp.ne.s32.totalorder %s159_s2, %s98_s26  ;;  %p102_p0 = scmp.lt.u32.totalorder %s98_s26, %s159_s2 }
  0x25   :  { %p104_p1 = pnand %p102_p0, %p99_p13 }
  0x27   :  { %107 = shalt.err (!%p104_p1)
}
  0x28   :  { %55 = dma.vmem_to_hbm [thread:$0]  %s53_s0, 64, %s159_s2, [#allocation4]  }
  0x29   :  { %110 = dma.done.wait [#allocation4], 64  }
  0x2a   :  { %111 = vsyncadd [#allocation4], 4294967232 }
  0x2b   :  { %59 = vsyncpa [#allocation3], 1 }
  0x2c   :  { %60 = vsyncpa [#allocation4], 1 }

</bundles_post_ra>
